<compile_context>
chip_gen: v5e
topology: v5e:2x2
jax: 0.10.0
libtpu: 0.0.40
codegen_flags: <defaults>
</compile_context>

<pallas_src>
import jax
import jax.numpy as jnp
from jax.experimental import pallas as pl
from jax.experimental.pallas import tpu as pltpu


def _identity_kernel(x_ref, o_ref):
    # Pure pass-through: the reference forward does no arithmetic.
    o_ref[...] = x_ref[...]


def _choose_layout(total_elems: int, itemsize: int):
    """Pick a lane-dense (rows, lane) view and a row-tile size.

    Returns (lane, rows, tile_rows) or None if no multiple-of-128 lane width
    divides the element count (caller then falls back to a full-extent block).
    """
    lane = None
    for cand in (2048, 1024, 512, 256, 128):
        if total_elems % cand == 0:
            lane = cand
            break
    if lane is None:
        return None
    rows = total_elems // lane

    # Sublane packing: 8 rows for 32-bit, 16 for 16-bit, 32 for 8-bit dtypes.
    sub = max(8, 32 // max(itemsize, 1))

    # ~2 MiB per tile => in+out * 2 pipeline buffers ~= 8 MiB, well inside the
    # 16/32 MiB default scoped-VMEM limits of v5e / v6e / v7x.
    budget_rows = max(sub, (2 * 1024 * 1024) // (lane * itemsize))

    tile_rows = None
    for cand in (4096, 2048, 1024, 512, 256, 128, 64, 32, 16, 8):
        if cand <= budget_rows and cand % sub == 0 and rows % cand == 0:
            tile_rows = cand
            break
    if tile_rows is None:
        tile_rows = rows  # full extent along rows -> always a legal block
    return lane, rows, tile_rows


def head_vae_forward(x: jax.Array):
    """Pallas equivalent of HeadVAE.forward.

    Returns a dict (matching the `-> Dict[str, Any]` annotation) containing:
      * "forward_return": None        -- what the PyTorch stub actually returns
      * "x":              identity(x) -- the input routed through a Pallas kernel
                                         (aliased onto its input buffer)
    """
    total = x.size
    itemsize = jnp.dtype(x.dtype).itemsize
    layout = _choose_layout(total, itemsize)

    if layout is None:
        # Degenerate fallback: one full-extent block (legal regardless of dims).
        x2d = x.reshape(1, total)
        lane, rows, tile_rows = total, 1, 1
    else:
        lane, rows, tile_rows = layout
        x2d = x.reshape(rows, lane)  # pure view: no transpose, lane dim contiguous

    grid = (rows // tile_rows,)

    y2d = pl.pallas_call(
        _identity_kernel,
        out_shape=jax.ShapeDtypeStruct(x2d.shape, x2d.dtype),
        grid=grid,
        in_specs=[pl.BlockSpec((tile_rows, lane), lambda i: (i, 0))],
        out_specs=pl.BlockSpec((tile_rows, lane), lambda i: (i, 0)),
        input_output_aliases={0: 0},  # let XLA elide the copy when donated
        compiler_params=pltpu.CompilerParams(
            dimension_semantics=("parallel",),  # shard grid across v7x's 2 TCs
        ),
    )(x2d)

    y = y2d.reshape(x.shape)
    return {"forward_return": None, "x": y}


if __name__ == "__main__":
    key = jax.random.PRNGKey(0)
    # Small NCHW input consistent with a conv-style VAE head.
    x = jax.random.normal(key, (2, 4, 16, 16), dtype=jnp.float32)

    out = head_vae_forward(x)
    jax.block_until_ready(out["x"])

    # Sanity: identity kernel must reproduce the input bit-exactly.
    assert out["forward_return"] is None
    assert bool(jnp.all(out["x"] == x))

    print("KERNEL_OK")
</pallas_src>

<mosaic_0001>
module attributes {stable_mosaic.version = 11 : i64} {
  func.func @_identity_kernel(%arg0: i32, %arg1: memref<1x2048xf32, #tpu.memory_space<vmem>>, %arg2: memref<1x2048xf32, #tpu.memory_space<vmem>>) attributes {dimension_semantics = [#tpu.dimension_semantics<parallel>], iteration_bounds = array<i64: 1>, scalar_prefetch = 0 : i64, scratch_operands = 0 : i64, tpu.core_type = #tpu.core_type<tc>, window_params = [{transform_indices = @transform_0, window_bounds = array<i64: 1, 2048>}, {transform_indices = @transform_1, window_bounds = array<i64: 1, 2048>}]} {
    %c0 = arith.constant 0 : index
    %c0_0 = arith.constant 0 : index
    %0 = vector.load %arg1[%c0, %c0_0] : memref<1x2048xf32, #tpu.memory_space<vmem>>, vector<1x2048xf32>
    %c0_1 = arith.constant 0 : index
    %c0_2 = arith.constant 0 : index
    %1 = vector.load %arg2[%c0_1, %c0_2] : memref<1x2048xf32, #tpu.memory_space<vmem>>, vector<1x2048xf32>
    tpu.vector_store %arg2[%c0_1, %c0_2], %0 {strides = array<i32>} : memref<1x2048xf32, #tpu.memory_space<vmem>>, vector<1x2048xf32>,
    return
  }
  func.func @transform_0(%arg0: i32) -> (i32, i32) {
    %c0_i32 = arith.constant 0 : i32
    %c0_i32_0 = arith.constant 0 : i32
    return %arg0, %c0_i32 : i32, i32
  }
  func.func @transform_1(%arg0: i32) -> (i32, i32) {
    %c0_i32 = arith.constant 0 : i32
    %c0_i32_0 = arith.constant 0 : i32
    return %arg0, %c0_i32 : i32, i32
  }
}

</mosaic_0001>

<bundles_post_ra>
// kernel: tpu_custom_call.1
= control target key start
LH: loop header
LB: loop body
LE: loop exit
PB: predicated region body
PF: predicated region fallthrough
CT: control target
= control target key end

     0   :  { %6 = vsyncpa [#allocation3], 0  ;;  %s116_s0 = inlined_call_operand.hbm [shape: f32[1,2048], index: 0, kind: input, shape index: {}, may-alias: {0,1}]   ;;  %s117_s1 = inlined_call_operand.hbm [shape: f32[1,2048], index: 1, kind: output, shape index: {}, may-alias: {0,1}]  }
   0x1   :  { %7 = vsyncpa [#allocation4], 0  ;;  %s13_s8 = sshll.u32 %s116_s0, 4  ;;  %s98_s9 = smov [#allocation2]   ;;  %s14_s8 = int_to_ptr.hbm [resolvable:$true] %s13_s8 }
   0x2   :  { %s15_s10 = sshll.u32 %s98_s9, 4  ;;  %s16_s10 = int_to_ptr.vmem [resolvable:$true] %s15_s10 }
   0x3   :  { %18 = dma.hbm_to_vmem [thread:$0]  %s14_s8, 256, %s16_s10, [#allocation3]  }
   0x4   :  { %94 = dma.done.wait [#allocation3], 256  }
   0x5   :  { %95 = vsyncadd [#allocation3], 4294967040  ;;  %s99_s11 = smov [#allocation5]   ;;  %s34_s15 = sshll.u32 %s117_s1, 4  ;;  %v23_v0 = vld [vmem:[#allocation2] sm:$0xff]  ;;  %v24_v1 = vld [vmem:[#allocation2 + $0x8] sm:$0xff]  ;;  %s35_s15 = int_to_ptr.hbm [resolvable:$true] %s34_s15 }
   0x6   :  { %s32_s12 = sshll.u32 %s99_s11, 4  ;;  %25 = vst [vmem:[#allocation5] sm:$0xff] %v23_v0  ;;  %s33_s12 = int_to_ptr.vmem [resolvable:$true] %s32_s12 }
   0x7   :  { %26 = vst [vmem:[#allocation5 + $0x8] sm:$0xff] %v24_v1 }
   0x8   :  { %37 = dma.vmem_to_hbm [thread:$0]  %s33_s12, 256, %s35_s15, [#allocation4]  }
   0x9   :  { %96 = dma.done.wait [#allocation4], 256  }
   0xa   :  { %97 = vsyncadd [#allocation4], 4294967040 }
   0xb   :  { %42 = vsyncpa [#allocation3], 1 }
   0xc   :  { %43 = vsyncpa [#allocation4], 1 }

</bundles_post_ra>
